<compile_context>
chip_gen: v5e
topology: v5e:2x2
jax: 0.10.0
libtpu: 0.0.40
codegen_flags: <defaults>
</compile_context>

<pallas_src>
import functools

import jax
import jax.numpy as jnp
from jax.experimental import pallas as pl
from jax.experimental.pallas import tpu as pltpu


def _round_up(x, m):
    return (x + m - 1) // m * m


# ----------------------------- Pallas kernel --------------------------------

def _ca_net_kernel(x_ref, w_ref, b_ref, eps_ref, out_ref, *, c_dim):
    # x:   (TM, t_dim)     bf16   VMEM tile
    # w:   (4c, t_dim)     bf16   resident (PyTorch layout, no host transpose)
    # b:   (1, 4c)         f32    resident
    # eps: (TM, c)         f32    VMEM tile
    # out: (TM, 3c or 4c)  f32    slab = [c_code | mu | logvar (| zero pad)]
    y = jax.lax.dot_general(
        x_ref[...], w_ref[...],
        dimension_numbers=(((1,), (1,)), ((), ())),     # x @ w.T on the MXU
        preferred_element_type=jnp.float32,
    )
    y = y + b_ref[...]                                  # (TM, 4c), f32

    c2 = 2 * c_dim
    # GLU: value * sigmoid(gate)    (sigmoid rides the EUP slot)
    h = y[:, :c2] * jax.nn.sigmoid(y[:, c2:])           # (TM, 2c)

    mu = h[:, :c_dim]
    logvar = h[:, c_dim:]
    std = jnp.exp(0.5 * logvar)                         # EUP
    c_code = eps_ref[...] * std + mu                    # reparametrize (f32 FMA)

    pieces = [c_code, mu, logvar]
    if out_ref.shape[-1] == 4 * c_dim:                  # keep the store lane-dense
        pieces.append(jnp.zeros_like(mu))
    out_ref[...] = jnp.concatenate(pieces, axis=-1)


# ------------------------------- wrapper -------------------------------------

@functools.partial(jax.jit, static_argnames=("c_dim",))
def ca_net_forward(text_embedding, eps, params, *, c_dim):
    """Fused CA_NET forward. Returns (c_code, mu, logvar), each (N, c_dim)."""
    N, t_dim = text_embedding.shape
    c4 = 4 * c_dim
    c3 = 3 * c_dim
    slab = c3 if c3 % 128 == 0 else c4          # lane-dense output slab width

    # bf16 for the heavy DMA + MXU operands; f32 bias / eps / epilogue.
    x = text_embedding.astype(jnp.bfloat16)                  # (N, t_dim)
    w = params["fc_w"].astype(jnp.bfloat16)                  # (4c, t_dim), as-is
    b = params["fc_b"].reshape(1, c4).astype(jnp.float32)    # (1, 4c)
    e = eps.astype(jnp.float32)                              # (N, c)

    # Batch tiling: big tiles (per-grid-step overhead ~0.35us), but aim for
    # >= 2 grid steps so v7x megacore can shard rows; 8-row aligned, cap 1024
    # keeps double-buffered tiles well inside every generation's scoped VMEM
    # (even at real StackGAN widths t_dim=1024 / c_dim=128 it is ~10 MiB).
    if N <= 8:
        tile_m = N                                  # single full-extent block
    else:
        tile_m = min(_round_up(pl.cdiv(N, 2), 8), 1024)
    grid = (pl.cdiv(N, tile_m),)                    # no input padding needed

    kernel = functools.partial(_ca_net_kernel, c_dim=c_dim)

    out_slab = pl.pallas_call(
        kernel,
        out_shape=jax.ShapeDtypeStruct((N, slab), jnp.float32),
        grid_spec=pltpu.PrefetchScalarGridSpec(
            num_scalar_prefetch=0,
            grid=grid,
            in_specs=[
                pl.BlockSpec((tile_m, t_dim), lambda i: (i, 0)),   # x tile
                pl.BlockSpec((c4, t_dim), lambda i: (0, 0)),       # w (resident)
                pl.BlockSpec((1, c4), lambda i: (0, 0)),           # b (resident)
                pl.BlockSpec((tile_m, c_dim), lambda i: (i, 0)),   # eps tile
            ],
            out_specs=pl.BlockSpec((tile_m, slab), lambda i: (i, 0)),
        ),
        compiler_params=pltpu.CompilerParams(
            dimension_semantics=("parallel",),
        ),
    )(x, w, b, e)

    c_code = out_slab[:, 0 * c_dim:1 * c_dim]
    mu = out_slab[:, 1 * c_dim:2 * c_dim]
    logvar = out_slab[:, 2 * c_dim:3 * c_dim]
    return c_code, mu, logvar


# --------------------------- pure-JAX reference ------------------------------

def _reference(text_embedding, eps, params, c_dim, *, bf16_inputs=True):
    x = text_embedding.astype(jnp.float32)
    w = params["fc_w"].astype(jnp.float32)
    if bf16_inputs:   # mirror the kernel's bf16 matmul-operand rounding
        x = x.astype(jnp.bfloat16).astype(jnp.float32)
        w = w.astype(jnp.bfloat16).astype(jnp.float32)
    y = jnp.dot(x, w.T, precision=jax.lax.Precision.HIGHEST) + params["fc_b"]
    c2 = 2 * c_dim
    h = y[:, :c2] * jax.nn.sigmoid(y[:, c2:])
    mu = h[:, :c_dim]
    logvar = h[:, c_dim:]
    c_code = eps * jnp.exp(0.5 * logvar) + mu
    return c_code, mu, logvar


# ---------------------------------- main -------------------------------------

if __name__ == "__main__":
    key = jax.random.PRNGKey(0)
    k_x, k_e, k_w, k_b = jax.random.split(key, 4)

    # Small, TPU-friendly stand-ins for cfg.TEXT.EMBEDDING_DIM / cfg.GAN.CONDITION_DIM.
    # N=24 exercises the multi-tile grid (2 steps) and the masked ragged tail.
    N, T_DIM, C_DIM = 24, 128, 32

    text_embedding = jax.random.normal(k_x, (N, T_DIM), jnp.float32)
    # eps is the N(0,1) draw from reparametrize(); generated here (deterministic)
    # and passed into the kernel so the forward is reproducible/verifiable.
    eps = jax.random.normal(k_e, (N, C_DIM), jnp.float32)

    params = {
        "fc_w": 0.05 * jax.random.normal(k_w, (4 * C_DIM, T_DIM), jnp.float32),
        "fc_b": 0.1 * jax.random.normal(k_b, (4 * C_DIM,), jnp.float32),
    }

    c_code, mu, logvar = ca_net_forward(text_embedding, eps, params, c_dim=C_DIM)
    c_code = jax.block_until_ready(c_code)
    mu = jax.block_until_ready(mu)
    logvar = jax.block_until_ready(logvar)

    assert c_code.shape == (N, C_DIM) and mu.shape == (N, C_DIM) and logvar.shape == (N, C_DIM)

    # Tight check vs. a reference that follows the same bf16-operand matmul path.
    rc, rm, rl = _reference(text_embedding, eps, params, C_DIM, bf16_inputs=True)
    assert jnp.allclose(c_code, rc, atol=2e-4, rtol=2e-4)
    assert jnp.allclose(mu, rm, atol=2e-4, rtol=2e-4)
    assert jnp.allclose(logvar, rl, atol=2e-4, rtol=2e-4)

    # Loose semantic check vs. the pure-f32 PyTorch-equivalent math.
    fc, fm, fl = _reference(text_embedding, eps, params, C_DIM, bf16_inputs=False)
    assert jnp.allclose(c_code, fc, atol=2e-2, rtol=2e-2)
    assert jnp.allclose(mu, fm, atol=2e-2, rtol=2e-2)
    assert jnp.allclose(logvar, fl, atol=2e-2, rtol=2e-2)

    print("KERNEL_OK")
</pallas_src>

<mosaic_0001>
module attributes {stable_mosaic.version = 11 : i64} {
  func.func @_ca_net_kernel(%arg0: i32, %arg1: memref<16x128xbf16, #tpu.memory_space<vmem>>, %arg2: memref<128x128xbf16, #tpu.memory_space<vmem>>, %arg3: memref<1x128xf32, #tpu.memory_space<vmem>>, %arg4: memref<16x32xf32, #tpu.memory_space<vmem>>, %arg5: memref<16x128xf32, #tpu.memory_space<vmem>>) attributes {dimension_semantics = [#tpu.dimension_semantics<parallel>], iteration_bounds = array<i64: 2>, scalar_prefetch = 0 : i64, scratch_operands = 0 : i64, tpu.core_type = #tpu.core_type<tc>, window_params = [{transform_indices = @transform_0, window_bounds = array<i64: 16, 128>}, {pipeline_mode = #tpu.pipeline_mode<synchronous>, transform_indices = @transform_1, window_bounds = array<i64: 128, 128>}, {pipeline_mode = #tpu.pipeline_mode<synchronous>, transform_indices = @transform_2, window_bounds = array<i64: 1, 128>}, {transform_indices = @transform_3, window_bounds = array<i64: 16, 32>}, {transform_indices = @transform_4, window_bounds = array<i64: 16, 128>}]} {
    %c0 = arith.constant 0 : index
    %c0_0 = arith.constant 0 : index
    %0 = vector.load %arg1[%c0, %c0_0] : memref<16x128xbf16, #tpu.memory_space<vmem>>, vector<16x128xbf16>
    %c0_1 = arith.constant 0 : index
    %c0_2 = arith.constant 0 : index
    %1 = vector.load %arg2[%c0_1, %c0_2] : memref<128x128xbf16, #tpu.memory_space<vmem>>, vector<128x128xbf16>
    %cst = arith.constant dense<0.000000e+00> : vector<16x128xf32>
    %2 = tpu.matmul %0, %1, %cst {dimension_numbers = #tpu.dot_dimension_numbers<[1], [1], [0], [0], [0, 0, 1, 0], [], []>} : vector<16x128xbf16>, vector<128x128xbf16>, vector<16x128xf32> -> vector<16x128xf32>
    %c0_3 = arith.constant 0 : index
    %c0_4 = arith.constant 0 : index
    %3 = vector.load %arg3[%c0_3, %c0_4] : memref<1x128xf32, #tpu.memory_space<vmem>>, vector<1x128xf32>
    %4 = vector.broadcast %3 : vector<1x128xf32> to vector<16x128xf32>
    %5 = arith.addf %2, %4 : vector<16x128xf32>
    %6 = vector.extract_strided_slice %5 {offsets = [0, 0], sizes = [16, 64], strides = [1, 1]} : vector<16x128xf32> to vector<16x64xf32>
    %7 = vector.extract_strided_slice %5 {offsets = [0, 64], sizes = [16, 64], strides = [1, 1]} : vector<16x128xf32> to vector<16x64xf32>
    %8 = arith.negf %7 : vector<16x64xf32>
    %9 = math.exp %8 : vector<16x64xf32>
    %cst_5 = arith.constant 1.000000e+00 : f32
    %10 = vector.broadcast %cst_5 : f32 to vector<16x64xf32>
    %11 = arith.addf %10, %9 : vector<16x64xf32>
    %12 = arith.divf %10, %11 : vector<16x64xf32>
    %13 = arith.mulf %6, %12 : vector<16x64xf32>
    %14 = vector.extract_strided_slice %13 {offsets = [0, 0], sizes = [16, 32], strides = [1, 1]} : vector<16x64xf32> to vector<16x32xf32>
    %15 = vector.extract_strided_slice %13 {offsets = [0, 32], sizes = [16, 32], strides = [1, 1]} : vector<16x64xf32> to vector<16x32xf32>
    %cst_6 = arith.constant 5.000000e-01 : f32
    %16 = vector.broadcast %cst_6 : f32 to vector<16x32xf32>
    %17 = arith.mulf %16, %15 : vector<16x32xf32>
    %18 = math.exp %17 : vector<16x32xf32>
    %c0_7 = arith.constant 0 : index
    %c0_8 = arith.constant 0 : index
    %19 = vector.load %arg4[%c0_7, %c0_8] : memref<16x32xf32, #tpu.memory_space<vmem>>, vector<16x32xf32>
    %20 = arith.mulf %19, %18 : vector<16x32xf32>
    %21 = arith.addf %20, %14 : vector<16x32xf32>
    %cst_9 = arith.constant 0.000000e+00 : f32
    %22 = vector.broadcast %cst_9 : f32 to vector<16x32xf32>
    %23 = tpu.concatenate %21, %14, %15, %22 in 1 : vector<16x32xf32>, vector<16x32xf32>, vector<16x32xf32>, vector<16x32xf32> -> vector<16x128xf32>
    %c0_10 = arith.constant 0 : index
    %c0_11 = arith.constant 0 : index
    %24 = vector.load %arg5[%c0_10, %c0_11] : memref<16x128xf32, #tpu.memory_space<vmem>>, vector<16x128xf32>
    tpu.vector_store %arg5[%c0_10, %c0_11], %23 {strides = array<i32>} : memref<16x128xf32, #tpu.memory_space<vmem>>, vector<16x128xf32>,
    return
  }
  func.func @transform_0(%arg0: i32) -> (i32, i32) {
    %c0_i32 = arith.constant 0 : i32
    %c0_i32_0 = arith.constant 0 : i32
    return %arg0, %c0_i32 : i32, i32
  }
  func.func @transform_1(%arg0: i32) -> (i32, i32) {
    %c0_i32 = arith.constant 0 : i32
    %c0_i32_0 = arith.constant 0 : i32
    %c0_i32_1 = arith.constant 0 : i32
    return %c0_i32, %c0_i32_0 : i32, i32
  }
  func.func @transform_2(%arg0: i32) -> (i32, i32) {
    %c0_i32 = arith.constant 0 : i32
    %c0_i32_0 = arith.constant 0 : i32
    %c0_i32_1 = arith.constant 0 : i32
    return %c0_i32, %c0_i32_0 : i32, i32
  }
  func.func @transform_3(%arg0: i32) -> (i32, i32) {
    %c0_i32 = arith.constant 0 : i32
    %c0_i32_0 = arith.constant 0 : i32
    return %arg0, %c0_i32 : i32, i32
  }
  func.func @transform_4(%arg0: i32) -> (i32, i32) {
    %c0_i32 = arith.constant 0 : i32
    %c0_i32_0 = arith.constant 0 : i32
    return %arg0, %c0_i32 : i32, i32
  }
}

</mosaic_0001>

<bundles_post_ra>
// kernel: ca_net_forward.1
= control target key start
LH: loop header
LB: loop body
LE: loop exit
PB: predicated region body
PF: predicated region fallthrough
CT: control target
= control target key end

     0   :  { %s966_s15 = smov 0   ;;  %s968_s16 = smov 0   ;;  %s1083_s0 = inlined_call_operand.vmem [shape: bf16[24,128], index: 0, kind: input, shape index: {}]   ;;  %s1084_s1 = inlined_call_operand.vmem [shape: bf16[128,128], index: 1, kind: input, shape index: {}]   ;;  %s1085_s2 = inlined_call_operand.vmem [shape: f32[1,128], index: 2, kind: input, shape index: {}]   ;;  %s1086_s3 = inlined_call_operand.vmem [shape: f32[24,32], index: 3, kind: input, shape index: {}]   ;;  %s1087_s4 = inlined_call_operand.vmem [shape: f32[24,128], index: 4, kind: output, shape index: {}]  }
   0x1   :  { %s970_s17 = smov 0  }
   0x2 LB: > { %s979_s18 = sadd.s32 4294967295, %s904_s17   ;;  %s981_s19 = sadd.s32 1, %s904_s17   ;;  %s904_s17 = sphi %s970_s17, %s1091_s17   ;;  %s900_s16 = sphi %s968_s16, %s1090_s16   ;;  %s896_s15 = sphi %s966_s15, %s1089_s15  }
   0x3   : > { %s112_s20 = ssub.s32 %s904_s17, %s981_s19  ;;  %s115_s21 = sadd.s32 1, %s900_s16 }
   0x4   : > { %p113_p0 = scmp.eq.s32.totalorder %s112_s20, 0  ;;  %p125_p1 = scmp.ne.s32.totalorder %s900_s16, %s896_s15 }
   0x5   : > { %p126_p2 = scmp.eq.s32.totalorder %s979_s18, 1  ;;  %p673_p3 = scmp.ge.s32.totalorder %s904_s17, 1 }
   0x6   : > { %s989_s22 = scalar_select %p113_p0, %s900_s16, %s115_s21  }
   0x7   : > { %p991_p4 = por %p126_p2, %p125_p1  ;;  %p190_p5 = scmp.lt.s32.totalorder %s904_s17, 3 }
   0x9   : > { %p191_p6 = pnand %p673_p3, %p190_p5 }
   0xa   : > { %s1014_s10 = sshll.u32 (!%p191_p6), %s979_s18, 1  ;;  %s938_s28 = smov (!%p191_p6), 64  }
   0xb   : > { %194 = sbr.rel (%p191_p6) target bundleno = 534 (0x216), region = 36  ;;  %p233_p7 = scmp.lt.s32.totalorder (!%p191_p6), %s1014_s10, 2 }
   0xc   : > { %s939_s29 = smov (!%p191_p6), 32   ;;  %s940_s30 = smov (!%p191_p6), 96  }
   0xd   : > { %s225_s9 = sand.u32 (!%p191_p6), 1, %s896_s15  }
   0xe   : > { %s674_s11 = sshll.u32 (!%p191_p6), %s225_s9, 4 }
   0xf   : > { %s1038_s12 = scalar_lea.vmem (!%p191_p6), [#allocation2], %s674_s11  }
  0x10   : > { %v742_v0 = vld [vmem:[%s1084_s1 + $0x38] sm:$0xff]  ;;  %v741_v1 = vld [vmem:[%s1084_s1 + $0x30] sm:$0xff]  ;;  %v740_v2 = vld [vmem:[%s1084_s1 + $0x28] sm:$0xff]  ;;  %s1021_s13 = scalar_select %p233_p7, %s1014_s10, 2  ;;  %vm427_vm8 = vcmask 261120   ;;  %vm430_vm9 = vcmask 523264  }
  0x11   : > { %337 = vmatpush.bf16.xpose.msra.mxu0 %v742_v0  ;;  %v739_v3 = vld [vmem:[%s1084_s1 + $0x20] sm:$0xff]  ;;  %v738_v4 = vld [vmem:[%s1084_s1 + $0x18] sm:$0xff]  ;;  %v737_v5 = vld [vmem:[%s1084_s1 + $0x10] sm:$0xff]  ;;  %vm433_vm10 = vcmask 785408   ;;  %s446_s15 = ssub.s32 (%p991_p4), 3, %s1014_s10 }
  0x12   : > { %v736_v6 = vld [vmem:[%s1084_s1 + $0x8] sm:$0xff]  ;;  %v735_v7 = vld [vmem:[%s1084_s1] sm:$0xff]  ;;  %s676_s20 = sshll.u32 %s1021_s13, 2  ;;  %s678_s5 = sshll.u32 %s1021_s13, 3 }
  0x13   : > { %s236_s25 = scalar_lea.vmem %s1083_s0, %s676_s20  ;;  %v837_v9 = vld [vmem:[%s1085_s2] ss:$0 sm:$0xff]  ;;  %s250_s8 = scalar_lea.vmem %s1086_s3, %s678_s5 }
  0x14   : > { %v734_v8 = vld [vmem:[%s236_s25] sm:$0xff]  ;;  %v406_v57 = vld [vmem:[%s250_s8 + $0x8] sm:$0xff]  ;;  %s743_s13 = sshll.u32 (%p991_p4), %s979_s18, 4  ;;  %p447_p8 = scmp.lt.s32.totalorder (%p991_p4), %s446_s15, 2 }
  0x15   : > { %v405_v50 = vld [vmem:[%s250_s8] sm:$0xff]  ;;  %s1049_s20 = scalar_lea.vmem (%p991_p4), %s1087_s4, %s743_s13  }
  0x19   : > { %338 = vmatpush.bf16.xpose.msra.mxu0 %v741_v1 }
  0x21   : > { %339 = vmatpush.bf16.xpose.msra.mxu0 %v740_v2 }
  0x29   : > { %340 = vmatpush.bf16.xpose.msra.mxu0 %v739_v3 }
  0x31   : > { %341 = vmatpush.bf16.xpose.msra.mxu0 %v738_v4 }
  0x39   : > { %342 = vmatpush.bf16.xpose.msra.mxu0 %v737_v5 }
  0x41   : > { %343 = vmatpush.bf16.xpose.msra.mxu0 %v736_v6 }
  0x49   : > { %344 = vmatpush.bf16.xpose.msra.mxu0 %v735_v7 }
  0x50   : > { %345 = vmatmul.bf16.vlgmr.msra.gmra.mxu0 %v734_v8 }
  0xcd   : > { %v346_v10 = vpop.f32.mrf.mxu0 }
  0xce   : > { %v347_v11 = vadd.f32 %v837_v9, %v346_v10 }
  0xd0   : > { %v715_v12 = vmul.f32 -1.442695, %v347_v11 }
  0xd2   : > { %838 = vpow2.f32 %v715_v12 }
  0xd5   : > { %v348_v13 = vpop.f32.mrf.mxu0 }
  0xd6   : > { %v349_v14 = vadd.f32 %v837_v9, %v348_v13 }
  0xd8   : > { %v839_v15 = vpop.eup %838  ;;  %v716_v16 = vmul.f32 -1.442695, %v349_v14 }
  0xd9   : > { %v357_v17 = vadd.f32 1.0, %v839_v15 }
  0xda   : > { %840 = vpow2.f32 %v716_v16 }
  0xdb   : > { %842 = vrcp.f32 %v357_v17  ;;  %v370_v23 = vand.u32 2147483648, %v357_v17  ;;  %v368_v25 = vand.u32 2147483647, %v357_v17  ;;  %vm364_vm1 = vweird.f32 %v357_v17 }
  0xdd   : > { %v371_v28 = vor.u32 1.1754944e-38, %v370_v23  ;;  %vm369_vm3 = vcmp.eq.f32.partialorder %v368_v25, 8.507059e+37 }
  0xe0   : > { %v841_v18 = vpop.eup %840 }
  0xe1   : > { %v843_v19 = vpop.eup %842  ;;  %v358_v20 = vadd.f32 1.0, %v841_v18 }
  0xe2   : > { %v360_v21 = vmul.f32 %v843_v19, %v357_v17  ;;  %vm365_vm0 = vweird.f32 %v843_v19 }
  0xe3   : > { %844 = vrcp.f32 %v358_v20  ;;  %vm366_vm2 = vmor %vm364_vm1, %vm365_vm0  ;;  %v385_v33 = vand.u32 2147483648, %v358_v20  ;;  %v383_v35 = vand.u32 2147483647, %v358_v20  ;;  %vm379_vm5 = vweird.f32 %v358_v20 }
  0xe4   : > { %v361_v22 = vsub.f32 1.0, %v360_v21 }
  0xe5   : > { %v386_v37 = vor.u32 1.1754944e-38, %v385_v33  ;;  %vm384_vm7 = vcmp.eq.f32.partialorder %v383_v35, 8.507059e+37 }
  0xe6   : > { %v362_v24 = vmul.f32 %v843_v19, %v361_v22 }
  0xe8   : > { %v363_v26 = vadd.f32 %v843_v19, %v362_v24 }
  0xe9   : > { %v845_v27 = vpop.eup %844 }
  0xea   : > { %v367_v29 = vsel %vm366_vm2, %v843_v19, %v363_v26  ;;  %v375_v30 = vmul.f32 %v845_v27, %v358_v20  ;;  %vm380_vm4 = vweird.f32 %v845_v27 }
  0xeb   : > { %v372_v31 = vsel %vm369_vm3, %v371_v28, %v367_v29  ;;  %vm381_vm6 = vmor %vm379_vm5, %vm380_vm4 }
  0xec   : > { %391 = vrot.lane.b32.xlu0 %v372_v31, %s938_s28  ;;  %v376_v32 = vsub.f32 1.0, %v375_v30 }
  0xee   : > { %v377_v34 = vmul.f32 %v845_v27, %v376_v32 }
  0xf0   : > { %v378_v36 = vadd.f32 %v845_v27, %v377_v34 }
  0xf2   : > { %v382_v38 = vsel %vm381_vm6, %v845_v27, %v378_v36 }
  0xf3   : > { %v387_v39 = vsel %vm384_vm7, %v386_v37, %v382_v38 }
  0xf4   : > { %393 = vrot.lane.b32.xlu0 %v387_v39, %s938_s28 }
 0x15e   : > { %v392_v40 = vpop.permute.xlu0 %391 }
 0x15f   : > { %v397_v41 = vmul.f32 %v392_v40, %v347_v11 }
 0x161   : > { %v399_v42 = vmul.f32 0.5, %v397_v41  ;;  %421 = vrot.lane.b32.xlu2 %v397_v41, %s939_s29 }
 0x163   : > { %v401_v43 = vmul.f32 1.442695, %v399_v42 }
 0x165   : > { %846 = vpow2.f32 %v401_v43 }
 0x166   : > { %v394_v44 = vpop.permute.xlu0 %393 }
 0x167   : > { %v398_v45 = vmul.f32 %v394_v44, %v349_v14 }
 0x169   : > { %v400_v46 = vmul.f32 0.5, %v398_v45  ;;  %423 = vrot.lane.b32.xlu2 %v398_v45, %s939_s29 }
 0x16b   : > { %v847_v47 = vpop.eup %846  ;;  %v403_v48 = vmul.f32 1.442695, %v400_v46 }
 0x16c   : > { %409 = vrot.lane.b32.xlu1 %v847_v47, %s940_s30 }
 0x16d   : > { %848 = vpow2.f32 %v403_v48 }
 0x173   : > { %v849_v49 = vpop.eup %848 }
 0x174   : > { %411 = vrot.lane.b32.xlu1 %v849_v49, %s940_s30 }
 0x1bb   : > { %v422_v53 = vpop.permute.xlu2 %421 }
 0x1c3   : > { %v424_v62 = vpop.permute.xlu2 %423 }
 0x1de   : > { %v410_v51 = vpop.permute.xlu1 %409 }
 0x1df   : > { %v415_v52 = vmul.f32 %v410_v51, %v405_v50 }
 0x1e1   : > { %v417_v54 = vadd.f32 %v415_v52, %v397_v41 }
 0x1e3   : > { %v428_v55 = vsel %vm427_vm8, %v417_v54, %v422_v53 }
 0x1e4   : > { %v431_v56 = vsel %vm430_vm9, %v428_v55, %v422_v53 }
 0x1e5   : > { %v434_v58 = vsel %vm433_vm10, %v431_v56, 0.0 }
 0x1e6   : > { %436 = vst [vmem:[%s1038_s12] sm:$0xff] %v434_v58  ;;  %v412_v59 = vpop.permute.xlu1 %411 }
 0x1e7   : > { %v416_v60 = vmul.f32 %v412_v59, %v406_v57 }
 0x1e9   : > { %v418_v61 = vadd.f32 %v416_v60, %v398_v45 }
 0x1ea   : > { %444 = sbr.rel (!%p991_p4) target bundleno = 534 (0x216), region = 40 }
 0x1eb   : > { %v429_v63 = vsel %vm427_vm8, %v418_v61, %v424_v62 }
 0x1ec   : > { %v432_v0 = vsel %vm430_vm9, %v429_v63, %v424_v62 }
 0x1ed   : > { %v435_v1 = vsel %vm433_vm10, %v432_v0, 0.0 }
 0x1ee   : > { %437 = vst [vmem:[%s1038_s12 + $0x8] sm:$0xff] %v435_v1 }
 0x1ef   : > { %s1093_s15 = smov (!%p447_p8, %s446_s15), 2 }
 0x1f0   : > { %s719_s21 = sshll.u32 %s1093_s15, 3 }
 0x1f1   : > { %p722_p9 = scmp.eq.s32.totalorder %s719_s21, 0 }
 0x1f2   : > { %s1055_s24 = sshrl.u32 (!%p722_p9), %s1093_s15, 1 }
 0x1f3   : > { %455 = sbr.rel (%p722_p9) target bundleno = 534 (0x216), region = 44  ;;  %p723_p10 = scmp.le.s32.totalorder (!%p722_p9), %s1055_s24, 0 }
 0x1f8   : > { %620 = sbr.rel (%p723_p10) target bundleno = 517 (0x205), region = 123  ;;  %s906_s18 = smov (!%p723_p10), %s1049_s20  }
 0x1f9   : > { %s910_s23 = smov (!%p723_p10), %s1038_s12   ;;  %s914_s10 = smov (!%p723_p10), 0  }
 0x1fa   : > { %s918_s25 = smov (!%p723_p10), 0  }
 0x1fd LB: >> { %v520_v2 = vld [vmem:[%s912_s23] sm:$0xff]  ;;  %v522_v3 = vld [vmem:[%s912_s23 + $0x8] sm:$0xff]  ;;  %s524_s26 = sadd.s32 1, %s916_s10  ;;  %s514_s25 = sadd.s32 1, %s920_s25   ;;  %s920_s25 = sphi %s918_s25, %s514_s25   ;;  %s916_s10 = sphi %s914_s10, %s915_s10   ;;  %s912_s23 = sphi %s910_s23, %s529_s23   ;;  %s908_s18 = sphi %s906_s18, %s530_s18  }
 0x1fe   : >> { %521 = vst [vmem:[%s908_s18] sm:$0xff] %v520_v2  ;;  %p525_p11 = scmp.ge.s32.totalorder %s524_s26, %s1055_s24  ;;  %p513_p12 = scmp.ge.s32.totalorder %s514_s25, %s1055_s24 }
 0x1ff   : >> { %523 = vst [vmem:[%s908_s18 + $0x8] sm:$0xff] %v522_v3 }
 0x200   : >> { %s1095_s26 = smov (%p525_p11, %s524_s26), 0  ;;  %516 = sbr.rel (!%p513_p12) target bundleno = 509 (0x1fd), region = 129 }
 0x201   : >> { %s724_s27 = sshll.u32 %s1095_s26, 4  ;;  %s915_s10 = smov %s1095_s26  }
 0x202   : >> { %s529_s23 = scalar_lea.vmem %s1038_s12, %s724_s27 [#allocation2]   ;;  %s530_s18 = scalar_lea.vmem %s1049_s20, %s724_s27  }
 0x205 PF: > { %s1065_s28 = sand.u32 1, %s1093_s15   ;;  %s744_s29 = sshll.u32 %s1055_s24, 4 }
 0x206   : > { %s535_s30 = scalar_lea.vmem %s1038_s12, %s744_s29 [#allocation2]   ;;  %s537_s5 = scalar_lea.vmem %s1049_s20, %s744_s29  }
 0x207   : > { %p729_p13 = scmp.le.s32.totalorder %s1065_s28, 0 }
 0x208   : > { %s922_s6 = smov (!%p729_p13), %s537_s5   ;;  %s926_s7 = smov (!%p729_p13), %s535_s30  }
 0x209   : > { %634 = sbr.rel (%p729_p13) target bundleno = 534 (0x216), region = 134  ;;  %s930_s8 = smov (!%p729_p13), 0  }
 0x20a   : > { %s934_s9 = smov (!%p729_p13), 0  }
 0x20e LB: >> { %v547_v4 = vld [vmem:[%s928_s7] sm:$0xff]  ;;  %s549_s11 = sadd.s32 1, %s932_s8  ;;  %s541_s9 = sadd.s32 1, %s936_s9   ;;  %s936_s9 = sphi %s934_s9, %s541_s9   ;;  %s932_s8 = sphi %s930_s8, %s931_s8   ;;  %s928_s7 = sphi %s926_s7, %s554_s7   ;;  %s924_s6 = sphi %s922_s6, %s555_s6  }
 0x20f   : >> { %548 = vst [vmem:[%s924_s6] sm:$0xff] %v547_v4  ;;  %p550_p0 = scmp.ge.s32.totalorder %s549_s11, %s1065_s28  ;;  %p540_p1 = scmp.ge.s32.totalorder %s541_s9, %s1065_s28 }
 0x211   : >> { %s1097_s11 = smov (%p550_p0, %s549_s11), 0  ;;  %543 = sbr.rel (!%p540_p1) target bundleno = 526 (0x20e), region = 140 }
 0x212   : >> { %s730_s12 = sshll.u32 %s1097_s11, 3  ;;  %s931_s8 = smov %s1097_s11  }
 0x213   : >> { %s554_s7 = scalar_lea.vmem %s535_s30, %s730_s12 [#allocation2]   ;;  %s555_s6 = scalar_lea.vmem %s537_s5, %s730_s12  }
 0x216 PF: > { %p11_p2 = scmp.ge.s32.totalorder %s981_s19, 4   ;;  %s1089_s15 = smov %s900_s16 }
 0x217   : > { %s1090_s16 = smov %s989_s22  ;;  %s1091_s17 = smov %s981_s19 }
 0x218   :  { %13 = sbr.rel (!%p11_p2) target bundleno = 2 (0x2), region = 151 }

</bundles_post_ra>
